<compile_context>
chip_gen: v5e
topology: v5e:2x2
jax: 0.10.0
libtpu: 0.0.40
codegen_flags: <defaults>
</compile_context>

<pallas_src>
import jax
import jax.numpy as jnp
from jax.experimental import pallas as pl
from jax.experimental.pallas import tpu as pltpu


def _round_up(v, m):
    return ((v + m - 1) // m) * m


def _pick_tile(dim, desired, align):
    """Pick a tile size for `dim`.

    Preference order:
      1. dim itself if it is <= desired (full-extent block; never needs padding).
      2. the largest `align`-multiple <= desired that divides dim (no padding).
      3. desired rounded up to `align` (caller must pad the array).
    """
    if dim <= desired:
        return dim
    t = (desired // align) * align
    while t >= align:
        if dim % t == 0:
            return t
        t -= align
    return _round_up(desired, align)


def _seq_embed_kernel(x_ref, w_ref, o_ref):
    """Computes one (tm, tn) output tile, accumulating over the C (category) grid axis.

    The output block index is constant along the k axis, so o_ref stays resident
    in VMEM across the reduction -- accumulate into it directly (f32 output).
    """
    k = pl.program_id(2)

    # Multi-hot row -> 0/1 mask in W's dtype (bf16: exactly representable),
    # then one MXU matmul == "gather the active rows of W and sum them".
    mask = (x_ref[...] != 0).astype(w_ref.dtype)
    part = jnp.dot(mask, w_ref[...], preferred_element_type=jnp.float32)

    @pl.when(k == 0)
    def _():
        o_ref[...] = part          # first K step: overwrite (also the 1-step fast path)

    @pl.when(k > 0)
    def _():
        o_ref[...] += part         # subsequent K steps: accumulate in place


def sequence_embedding(x, weight, *, tm=1024, tn=512, tk=1024):
    """SequenceEmbedding forward.

    x:      [B, C] multi-hot over categories (any numeric/bool dtype; nonzero == active).
    weight: [C, D] embedding table (any float dtype; computed in bf16, accumulated f32).
    returns [B, D] f32 -- per row, the sum of embeddings of the active categories.
    """
    B, C = x.shape
    C2, D = weight.shape
    assert C == C2, "row length must equal num_categories (column index == category id)"

    # Minimize HBM traffic of the two streamed operands:
    #  - x only needs nonzero-ness -> int8.
    #  - W in bf16 halves the dominant (re-streamed) table traffic and hits the
    #    native bf16 MXU path; accumulation stays f32 inside the kernel.
    if x.dtype.itemsize > 1:
        x = (x != 0).astype(jnp.int8)
    if weight.dtype != jnp.bfloat16:
        weight = weight.astype(jnp.bfloat16)

    # Tile picking: prefer full-extent or divisor tiles so we avoid materializing
    # padded copies (padding W costs an extra full read+write of the table).
    #  - tm (batch): sublane axis, align 8 (desired is a multiple of 32 anyway).
    #  - tk (categories): lane axis of x / sublane axis of W -> align 128.
    #  - tn (embedding dim): lane axis of W and out -> align 128 (lane-dense stores).
    tm = _pick_tile(B, tm, 8)
    tn = _pick_tile(D, tn, 128)
    tk = _pick_tile(C, tk, 128)

    Bp, Dp, Cp = _round_up(B, tm), _round_up(D, tn), _round_up(C, tk)

    # Zero padding (only when a divisor tile could not be found) is
    # semantics-preserving: padded x entries are 0 -> mask 0 -> no contribution.
    if (Bp, Cp) != (B, C):
        x = jnp.pad(x, ((0, Bp - B), (0, Cp - C)))
    if (Cp, Dp) != (C, D):
        weight = jnp.pad(weight, ((0, Cp - C), (0, Dp - D)))

    grid = (Bp // tm, Dp // tn, Cp // tk)  # reduction axis (C) last

    # TODO(synk): for very large C with few active categories per row, add a
    # scalar-prefetch gather variant (active indices in SMEM driving row DMAs of W)
    # instead of streaming the whole dense table (biggest win on v5e bandwidth).
    # TODO(synk): for tiny B*D on v7x, split the batch tile so a parallel grid
    # axis has >= 2 programs and both TensorCores are used.

    w_restreams = grid[0]          # W is re-read once per batch tile
    x_restreams = grid[1]          # x is re-read once per output-column tile

    out = pl.pallas_call(
        _seq_embed_kernel,
        out_shape=jax.ShapeDtypeStruct((Bp, Dp), jnp.float32),
        grid_spec=pltpu.PrefetchScalarGridSpec(
            num_scalar_prefetch=0,
            grid=grid,
            in_specs=[
                pl.BlockSpec((tm, tk), lambda i, j, k: (i, k)),   # x tile (int8)
                pl.BlockSpec((tk, tn), lambda i, j, k: (k, j)),   # W tile (bf16)
            ],
            out_specs=pl.BlockSpec((tm, tn), lambda i, j, k: (i, j)),  # resident across k
        ),
        compiler_params=pltpu.CompilerParams(
            dimension_semantics=("parallel", "parallel", "arbitrary"),
            # ~10 MiB used at default tiles; 48 MiB cap is safe on v5e/v6e (128 MiB)
            # and leaves headroom on v7x (64 MiB per TensorCore).
            vmem_limit_bytes=48 * 1024 * 1024,
        ),
        cost_estimate=pl.CostEstimate(
            flops=2 * Bp * Cp * Dp,
            bytes_accessed=(Bp * Cp * x.dtype.itemsize * x_restreams
                            + Cp * Dp * weight.dtype.itemsize * w_restreams
                            + Bp * Dp * 4),
            transcendentals=0,
        ),
    )(x, weight)

    if (Bp, Dp) != (B, D):
        out = out[:B, :D]
    return out


if __name__ == "__main__":
    key = jax.random.PRNGKey(0)
    k_w, k_x = jax.random.split(key)

    B = 8                # batch (number of multi-hot rows)
    num_categories = 16  # row length == embedding table size
    embedding_dim = 32

    # Deterministic embedding table (stand-in for nn.Embedding weights).
    weight = jax.random.normal(k_w, (num_categories, embedding_dim), dtype=jnp.float32)

    # Deterministic multi-hot input (~30% active per row), int8 to minimize x DMA.
    x = (jax.random.uniform(k_x, (B, num_categories)) < 0.3).astype(jnp.int8)

    out = jax.block_until_ready(sequence_embedding(x, weight))

    # Reference: gather-nonzero-and-sum, in plain JAX (f32).
    ref = jnp.where((x != 0)[:, :, None], weight[None, :, :], 0.0).sum(axis=1)
    assert out.shape == (B, embedding_dim)
    # W participates in bf16 (mask is exact in bf16), so allow bf16-level tolerance.
    assert jnp.allclose(out, ref, atol=2e-2, rtol=2e-2)

    print("KERNEL_OK")
</pallas_src>

<mosaic_0001>
module attributes {stable_mosaic.version = 11 : i64} {
  func.func @_seq_embed_kernel(%arg0: i32, %arg1: i32, %arg2: i32, %arg3: memref<8x16xi8, #tpu.memory_space<vmem>>, %arg4: memref<16x32xbf16, #tpu.memory_space<vmem>>, %arg5: memref<8x32xf32, #tpu.memory_space<vmem>>) attributes {dimension_semantics = [#tpu.dimension_semantics<parallel>, #tpu.dimension_semantics<parallel>, #tpu.dimension_semantics<arbitrary>], iteration_bounds = array<i64: 1, 1, 1>, scalar_prefetch = 0 : i64, scratch_operands = 0 : i64, tpu.core_type = #tpu.core_type<tc>, window_params = [{transform_indices = @transform_0, window_bounds = array<i64: 8, 16>}, {transform_indices = @transform_1, window_bounds = array<i64: 16, 32>}, {transform_indices = @transform_2, window_bounds = array<i64: 8, 32>}]} {
    %c0 = arith.constant 0 : index
    %c0_0 = arith.constant 0 : index
    %0 = vector.load %arg3[%c0, %c0_0] : memref<8x16xi8, #tpu.memory_space<vmem>>, vector<8x16xi8>
    %c0_i8 = arith.constant 0 : i8
    %1 = vector.broadcast %c0_i8 : i8 to vector<8x16xi8>
    %2 = arith.cmpi ne, %0, %1 : vector<8x16xi8>
    %3 = arith.extui %2 : vector<8x16xi1> to vector<8x16xi32>
    %4 = arith.sitofp %3 : vector<8x16xi32> to vector<8x16xf32>
    %5 = arith.truncf %4 : vector<8x16xf32> to vector<8x16xbf16>
    %c0_1 = arith.constant 0 : index
    %c0_2 = arith.constant 0 : index
    %6 = vector.load %arg4[%c0_1, %c0_2] : memref<16x32xbf16, #tpu.memory_space<vmem>>, vector<16x32xbf16>
    %cst = arith.constant dense<0.000000e+00> : vector<8x32xf32>
    %7 = tpu.matmul %5, %6, %cst {dimension_numbers = #tpu.dot_dimension_numbers<[1], [0], [0], [1], [0, 0, 1, 1], [], []>} : vector<8x16xbf16>, vector<16x32xbf16>, vector<8x32xf32> -> vector<8x32xf32>
    %c0_i32 = arith.constant 0 : i32
    %8 = arith.cmpi eq, %arg2, %c0_i32 : i32
    %9 = arith.extui %8 : i1 to i32
    %c0_i32_3 = arith.constant 0 : i32
    %10 = arith.cmpi ne, %9, %c0_i32_3 : i32
    scf.if %10 {
      %c0_6 = arith.constant 0 : index
      %c0_7 = arith.constant 0 : index
      %14 = vector.load %arg5[%c0_6, %c0_7] : memref<8x32xf32, #tpu.memory_space<vmem>>, vector<8x32xf32>
      tpu.vector_store %arg5[%c0_6, %c0_7], %7 {strides = array<i32>} : memref<8x32xf32, #tpu.memory_space<vmem>>, vector<8x32xf32>,
    } else {
    }
    %c0_i32_4 = arith.constant 0 : i32
    %11 = arith.cmpi sgt, %arg2, %c0_i32_4 : i32
    %12 = arith.extui %11 : i1 to i32
    %c0_i32_5 = arith.constant 0 : i32
    %13 = arith.cmpi ne, %12, %c0_i32_5 : i32
    scf.if %13 {
      %c0_6 = arith.constant 0 : index
      %c0_7 = arith.constant 0 : index
      %14 = vector.load %arg5[%c0_6, %c0_7] : memref<8x32xf32, #tpu.memory_space<vmem>>, vector<8x32xf32>
      %15 = arith.addf %14, %7 : vector<8x32xf32>
      %c0_8 = arith.constant 0 : index
      %c0_9 = arith.constant 0 : index
      %16 = vector.load %arg5[%c0_8, %c0_9] : memref<8x32xf32, #tpu.memory_space<vmem>>, vector<8x32xf32>
      tpu.vector_store %arg5[%c0_8, %c0_9], %15 {strides = array<i32>} : memref<8x32xf32, #tpu.memory_space<vmem>>, vector<8x32xf32>,
    } else {
    }
    return
  }
  func.func @transform_0(%arg0: i32, %arg1: i32, %arg2: i32) -> (i32, i32) {
    %c0_i32 = arith.constant 0 : i32
    return %arg0, %arg2 : i32, i32
  }
  func.func @transform_1(%arg0: i32, %arg1: i32, %arg2: i32) -> (i32, i32) {
    %c0_i32 = arith.constant 0 : i32
    return %arg2, %arg1 : i32, i32
  }
  func.func @transform_2(%arg0: i32, %arg1: i32, %arg2: i32) -> (i32, i32) {
    %c0_i32 = arith.constant 0 : i32
    return %arg0, %arg1 : i32, i32
  }
}

</mosaic_0001>

<bundles_post_ra>
// kernel: tpu_custom_call.1
= control target key start
LH: loop header
LB: loop body
LE: loop exit
PB: predicated region body
PF: predicated region fallthrough
CT: control target
= control target key end

     0   :  { %7 = vsyncpa [#allocation3], 0  ;;  %s233_s0 = inlined_call_operand.hbm [shape: s8[8,16], index: 0, kind: input, shape index: {}]   ;;  %s234_s1 = inlined_call_operand.hbm [shape: bf16[16,32], index: 1, kind: input, shape index: {}]   ;;  %s235_s2 = inlined_call_operand.hbm [shape: f32[8,32], index: 2, kind: output, shape index: {}]  }
   0x1   :  { %8 = vsyncpa [#allocation6], 0 }
   0x2   :  { %9 = vsyncpa [#allocation4], 0  ;;  %s15_s11 = sshll.u32 %s233_s0, 4  ;;  %s202_s12 = smov [#allocation2]   ;;  %s16_s11 = int_to_ptr.hbm [resolvable:$true] %s15_s11 }
   0x3   :  { %s17_s13 = sshll.u32 %s202_s12, 4  ;;  %s25_s16 = sshll.u32 %s234_s1, 4  ;;  %s18_s13 = int_to_ptr.vmem [resolvable:$true] %s17_s13  ;;  %s26_s16 = int_to_ptr.hbm [resolvable:$true] %s25_s16 }
   0x4   :  { %20 = dma.hbm_to_vmem [thread:$0]  %s16_s11, 32, %s18_s13, [#allocation3]  }
   0x5   :  { %s203_s17 = smov [#allocation5]   ;;  %s204_s19 = smov 64  }
   0x6   :  { %s27_s18 = sshll.u32 %s203_s17, 4  ;;  %s205_s20 = smov 4   ;;  %s28_s18 = int_to_ptr.vmem [resolvable:$true] %s27_s18 }
   0x7   :  { %33 = dma.hbm_to_vmem [thread:$0]  %s26_s16, 128, %s28_s18, [#allocation6], %s204_s19, %s204_s19, %s205_s20  }
   0x8   :  { %196 = dma.done.wait [#allocation3], 32  }
   0x9   :  { %197 = vsyncadd [#allocation3], 4294967264 }
   0xa   :  { %198 = dma.done.wait [#allocation6], 128  }
   0xb   :  { %199 = vsyncadd [#allocation6], 4294967168  ;;  %v116_v0 = vld [vmem:[#allocation5] sm:$0xff]  ;;  %v45_v1 = vld [vmem:[#allocation2] sm:$0x3]  ;;  %v206_v2 = vmov 0  }
   0xc   :  { %vm46_vm0 = vnez %v45_v1  ;;  %72 = vmatpush.bf16.msra.mxu0 %v116_v0  ;;  %v207_v5 = vmov 0.0   ;;  %vm61_vm2 = vcmask 130048   ;;  %s208_s0 = smov [#allocation7]   ;;  %s99_s23 = sshll.u32 %s235_s2, 4  ;;  %vm82_vm3 = vcmask 261120   ;;  %s100_s23 = int_to_ptr.hbm [resolvable:$true] %s99_s23 }
   0xd   :  { %v47_v3 = vsel %vm46_vm0, 16843009, %v206_v2  ;;  %s97_s1 = sshll.u32 %s208_s0, 4  ;;  %s98_s1 = int_to_ptr.vmem [resolvable:$true] %s97_s1 }
   0xe   :  { %v48_v4 = vunpack.c.0.s8 %v47_v3 }
  0x10   :  { %vm49_vm1 = vcmp.ne.s32.totalorder %v48_v4, 0 }
  0x11   :  { %v110_v6 = vsel %vm49_vm1, 1.0, %v207_v5 }
  0x12   :  { %v52_v7 = vpack.c.bf16 %v110_v6, %v110_v6 }
  0x14   :  { %115 = vmatmul.msk.bf16.vlgmr.msra.gmra.mxu0 %vm61_vm2, %v52_v7 }
  0x91   :  { %v74_v8 = vpop.f32.mrf.mxu0 }
  0x92   :  { %83 = vst.msk [vmem:[#allocation7] sm:$0xff] %vm82_vm3, %v74_v8 }
  0x93   :  { %102 = dma.vmem_to_hbm [thread:$0]  %s98_s1, 128, %s100_s23, [#allocation4]  }
  0x99   :  { %v76_v9 = vpop.f32.mrf.mxu0 }
  0x9a   :  { %200 = dma.done.wait [#allocation4], 128  }
  0x9b   :  { %201 = vsyncadd [#allocation4], 4294967168 }
  0x9c   :  { %107 = vsyncpa [#allocation3], 1 }
  0x9d   :  { %108 = vsyncpa [#allocation6], 1 }
  0x9e   :  { %109 = vsyncpa [#allocation4], 1 }

</bundles_post_ra>
